<compile_context>
chip_gen: v6e
topology: v6e:2x2x1
jax: 0.10.0
libtpu: 0.0.40
codegen_flags: <defaults>
</compile_context>

<pallas_src>
import functools
import numpy as np

import jax
import jax.numpy as jnp
from jax.experimental import pallas as pl
from jax.experimental.pallas import tpu as pltpu


# ----------------------------- small helpers --------------------------------

def _vmem_capacity_bytes():
    try:
        cap = getattr(pltpu.get_tpu_info(), "vmem_capacity_bytes", None)
        if cap:
            return int(cap)
    except Exception:
        pass
    return 128 * 1024 * 1024


_VMEM_CAP = _vmem_capacity_bytes()


def _round_up(n, m):
    return ((n + m - 1) // m) * m


def _divisor_tile(n, target, align):
    """Largest divisor of n that is a multiple of `align` and <= target
    (full-dim fallback)."""
    if n <= target or n % align != 0:
        return n
    t = (max(target, align) // align) * align
    while t >= align:
        if n % t == 0:
            return t
        t -= align
    return n


def _choose_tile(n, target, align):
    """Pick (tile, padded_n).  Prefers an exact divisor of n; otherwise pads n up
    to a tile multiple instead of silently falling back to a full-dim block
    (which is a VMEM cliff at long sequence lengths)."""
    if n <= target:
        return n, n                               # full-dim block is always legal
    target = max(target, align)
    t = (target // align) * align
    d = t
    while d >= align:
        if n % d == 0 and d >= max(align, t // 2):   # reasonably large exact divisor
            return d, n
        d -= align
    return t, _round_up(n, t)                     # pad instead of full-dim fallback


# ----------------------------- linear (projection) ---------------------------

def _linear_kernel(x_ref, w_ref, b_ref, o_ref, acc_ref):
    # grid = (rows, d_out tiles, d_in tiles);  d_in is the reduction axis.
    @pl.when(pl.program_id(2) == 0)
    def _init():
        acc_ref[...] = jnp.zeros_like(acc_ref)

    acc_ref[...] += jnp.dot(x_ref[...], w_ref[...],
                            preferred_element_type=jnp.float32)

    @pl.when(pl.program_id(2) == pl.num_programs(2) - 1)
    def _fin():
        o_ref[...] = (acc_ref[...] + b_ref[...].astype(jnp.float32)).astype(o_ref.dtype)


def linear_pallas(x2d, w, b, *, block_rows=512, block_out=512, block_in=1024):
    """x2d:(R,d_in) @ w:(d_in,d_out) + b:(1,d_out) -> (R,d_out), fully tiled."""
    R, d_in = x2d.shape
    d_out = w.shape[1]

    TR, Rp = _choose_tile(R, block_rows, 8)
    if Rp != R:                                   # pad rows; sliced off below
        x2d = jnp.pad(x2d, ((0, Rp - R), (0, 0)))
    TN = _divisor_tile(d_out, block_out, 128)
    TD = _divisor_tile(d_in, block_in, 128)

    isz = x2d.dtype.itemsize
    need = 2 * (TR * TD + TD * TN + TN + TR * TN) * isz + TR * TN * 4
    vmem_limit = int(min(0.9 * _VMEM_CAP, max(48 << 20, 2 * need)))

    cost = pl.CostEstimate(
        flops=int(2 * Rp * d_in * d_out),
        transcendentals=0,
        bytes_accessed=int(x2d.size * isz
                           + w.size * w.dtype.itemsize * (Rp // TR)
                           + b.size * b.dtype.itemsize
                           + Rp * d_out * isz))

    out = pl.pallas_call(
        _linear_kernel,
        out_shape=jax.ShapeDtypeStruct((Rp, d_out), x2d.dtype),
        grid_spec=pltpu.PrefetchScalarGridSpec(
            num_scalar_prefetch=0,
            grid=(Rp // TR, d_out // TN, d_in // TD),
            in_specs=[
                pl.BlockSpec((TR, TD), lambda r, n, k: (r, k)),
                pl.BlockSpec((TD, TN), lambda r, n, k: (k, n)),
                pl.BlockSpec((1, TN), lambda r, n, k: (0, n)),
            ],
            out_specs=pl.BlockSpec((TR, TN), lambda r, n, k: (r, n)),
            scratch_shapes=[pltpu.VMEM((TR, TN), jnp.float32)],
        ),
        compiler_params=pltpu.CompilerParams(
            dimension_semantics=("parallel", "parallel", "arbitrary"),
            vmem_limit_bytes=vmem_limit),
        cost_estimate=cost,
    )(x2d, w, b)
    return out[:R]


# ----------------------------- flash attention -------------------------------

def _flash_attn_kernel(*refs, scale, has_mask, kv_pad, nk_valid, kv_tile):
    if has_mask:
        mask_ref, q_ref, kT_ref, v_ref, out_ref, qs_ref, m_ref, l_ref, acc_ref = refs
    else:
        q_ref, kT_ref, v_ref, out_ref, qs_ref, m_ref, l_ref, acc_ref = refs

    ki = pl.program_id(2)

    @pl.when(ki == 0)
    def _init():
        # Cache the scaled q tile once per (b, qi); reused by every K/V step.
        qs_ref[...] = (q_ref[...] * scale).astype(qs_ref.dtype)
        m_ref[...] = jnp.full_like(m_ref, -jnp.inf)
        l_ref[...] = jnp.zeros_like(l_ref)
        acc_ref[...] = jnp.zeros_like(acc_ref)

    q = qs_ref[...]                # (H, TQ, hd)   already scaled
    kT = kT_ref[...]               # (H, hd, TK)   pre-transposed in the wrapper
    v = v_ref[...]                 # (H, TK, hdv)

    # Scores feed the MXU with K already in (hd, TK) layout -> no per-step
    # in-kernel XLU transpose of the K tile.  f32 accumulation.
    s = jnp.einsum('hqd,hdk->hqk', q, kT, preferred_element_type=jnp.float32)

    if has_mask:
        keep = mask_ref[...] != 0                             # (TQ, TK) int8 -> bool
        s = jnp.where(keep[None, :, :], s, -jnp.inf)
    if kv_pad:
        # Keys appended by tile padding (no user mask): mask them in-kernel.
        col = ki * kv_tile + jax.lax.broadcasted_iota(jnp.int32, s.shape[-2:], 1)
        s = jnp.where((col < nk_valid)[None, :, :], s, -jnp.inf)

    # Online softmax, exactly reproducing torch's global-max / clamp-to-0 / +1e-6.
    m_prev = m_ref[...]                                       # (H, TQ, 1)
    m_next = jnp.maximum(m_prev, jnp.max(s, axis=-1, keepdims=True))
    m_eff = jnp.where(m_next == -jnp.inf, 0.0, m_next)        # masked_fill(isinf(b), 0)
    alpha = jnp.exp(m_prev - m_eff)        # m_prev=-inf -> 0 (l/acc are 0 there)
    p = jnp.exp(s - m_eff)                 # masked (-inf) scores -> exactly 0
    l_ref[...] = alpha * l_ref[...] + jnp.sum(p, axis=-1, keepdims=True)
    acc_ref[...] = alpha * acc_ref[...] + jnp.einsum(
        'hqk,hkd->hqd', p.astype(v.dtype), v, preferred_element_type=jnp.float32)
    m_ref[...] = m_next

    @pl.when(ki == pl.num_programs(2) - 1)
    def _finalize():
        inv = pl.reciprocal(l_ref[...] + 1e-6, approx=True)   # EUP reciprocal
        # Per-head (H, TQ, hdv) store; no in-kernel head concat / relayout.
        out_ref[...] = (acc_ref[...] * inv).astype(out_ref.dtype)


def attention_pallas(q, k, v, params, n_head=None, mask=None,
                     block_q=512, block_k=512):
    """q:(B,nq,dq_in) k:(B,nk,dk_in) v:(B,nk,dv_in); mask broadcastable to (B,nq,nk).

    params = (wq, bq, wk, bk, wv, bv); weights pre-transposed to (d_in, d_out),
    biases (1, d_out).  Any (w, b) pair may be (None, None) -> identity, matching
    the torch module's optional transforms.
    """
    B, nq, _ = q.shape
    _, nk, _ = k.shape
    wq, bq, wk, bk, wv, bv = params

    def project(x, w, b):
        if w is None:
            return x
        n = x.shape[1]
        return linear_pallas(x.reshape(B * n, -1), w, b).reshape(B, n, w.shape[1])

    # Pre-project once (keeps K/V projections out of the streamed attention loop).
    qp = project(q, wq, bq)
    kp = project(k, wk, bk)
    vp = project(v, wv, bv)

    dk = kp.shape[-1]
    dv = vp.shape[-1]
    assert qp.shape[-1] == dk, "q/k feature dims must match after transforms"
    H = 1 if n_head is None else n_head
    assert dk % H == 0 and dv % H == 0
    hd, hdv = dk // H, dv // H
    has_mask = mask is not None
    isz = qp.dtype.itemsize

    # ---- tile selection under a VMEM budget (v7x has only 64 MiB physical) ----
    budget = int(0.55 * _VMEM_CAP)
    tq_t, tk_t = block_q, block_k
    while True:
        TQ, nq_p = _choose_tile(nq, tq_t, 32 if has_mask else 8)
        TK, nk_p = _choose_tile(nk, tk_t, 128)
        need = (2 * (H * TQ * hd * isz + H * TK * (hd + hdv) * isz
                     + H * TQ * hdv * isz + (TQ * TK if has_mask else 0))  # blocks (2-buf)
                + H * TQ * (hd * isz + 8 + 4 * hdv)                        # qs/m/l/acc scratch
                + 3 * H * TQ * TK * 4)                                     # s / p temporaries
        if need <= budget or (tk_t <= 128 and tq_t <= 64):
            break
        if tk_t > 128:
            tk_t //= 2       # shrink the K/V tile first (keeps HBM traffic unchanged)
        else:
            tq_t //= 2
    n_qt, n_kt = nq_p // TQ, nk_p // TK

    # ---- pad to tile multiples (instead of a silent full-dim block) -----------
    if nq_p != nq:
        qp = jnp.pad(qp, ((0, 0), (0, nq_p - nq), (0, 0)))
    if nk_p != nk:
        kp = jnp.pad(kp, ((0, 0), (0, nk_p - nk), (0, 0)))
        vp = jnp.pad(vp, ((0, 0), (0, nk_p - nk), (0, 0)))

    # Head split + K pre-transpose: wrapper-side layout plumbing only.
    qh = qp.reshape(B, nq_p, H, hd).transpose(0, 2, 1, 3)      # (B,H,nq,hd)
    khT = kp.reshape(B, nk_p, H, hd).transpose(0, 2, 3, 1)     # (B,H,hd,nk)  <- MXU-ready
    vh = vp.reshape(B, nk_p, H, hdv).transpose(0, 2, 1, 3)     # (B,H,nk,hdv)

    inputs, in_specs = [], []
    if has_mask:
        if mask.ndim == 1:                       # torch: mask.expand(nq, nk)
            mask = jnp.broadcast_to(mask, (nq, nk))
        if mask.ndim == 2:
            mask = mask[None]
        Bm = mask.shape[0]                       # keep batch dim deduplicated (1 or B)
        mask_i8 = jnp.broadcast_to(mask, (Bm, nq, nk)).astype(jnp.int8)
        if (nq_p, nk_p) != (nq, nk):             # padded rows/keys -> masked out
            mask_i8 = jnp.pad(mask_i8, ((0, 0), (0, nq_p - nq), (0, nk_p - nk)))
        inputs.append(mask_i8)
        if Bm == 1:
            in_specs.append(pl.BlockSpec((None, TQ, TK), lambda b, qi, ki: (0, qi, ki)))
        else:
            in_specs.append(pl.BlockSpec((None, TQ, TK), lambda b, qi, ki: (b, qi, ki)))

    inputs += [qh, khT, vh]
    in_specs += [
        pl.BlockSpec((None, H, TQ, hd),  lambda b, qi, ki: (b, 0, qi, 0)),
        pl.BlockSpec((None, H, hd, TK),  lambda b, qi, ki: (b, 0, 0, ki)),
        pl.BlockSpec((None, H, TK, hdv), lambda b, qi, ki: (b, 0, ki, 0)),
    ]

    kernel = functools.partial(
        _flash_attn_kernel,
        scale=1.0 / float(np.sqrt(dk)),          # torch scales by sqrt(FULL key dim)
        has_mask=has_mask,
        kv_pad=(nk_p != nk) and not has_mask,
        nk_valid=nk, kv_tile=TK)

    cost = pl.CostEstimate(
        flops=int(2 * B * H * nq_p * nk_p * (hd + hdv)),
        transcendentals=int(B * H * nq_p * nk_p),
        bytes_accessed=int(qh.size * isz
                           + (khT.size + vh.size) * isz * n_qt
                           + (mask_i8.size if has_mask else 0)
                           + B * nq_p * dv * isz))

    vmem_limit = int(min(0.9 * _VMEM_CAP, max(48 << 20, 2 * need)))

    out = pl.pallas_call(
        kernel,
        out_shape=jax.ShapeDtypeStruct((B, H, nq_p, hdv), qp.dtype),
        grid_spec=pltpu.PrefetchScalarGridSpec(
            num_scalar_prefetch=0,
            grid=(B, n_qt, n_kt),                 # K/V reduction axis innermost
            in_specs=in_specs,
            out_specs=pl.BlockSpec((None, H, TQ, hdv), lambda b, qi, ki: (b, 0, qi, 0)),
            scratch_shapes=[
                pltpu.VMEM((H, TQ, hd), qp.dtype),       # cached scaled q tile
                pltpu.VMEM((H, TQ, 1), jnp.float32),     # running max m
                pltpu.VMEM((H, TQ, 1), jnp.float32),     # running sum l
                pltpu.VMEM((H, TQ, hdv), jnp.float32),   # output accumulator
            ]),
        compiler_params=pltpu.CompilerParams(
            dimension_semantics=("parallel", "parallel", "arbitrary"),
            vmem_limit_bytes=vmem_limit),
        cost_estimate=cost,
    )(*inputs)

    # Merge heads in the wrapper (free reshape for H==1, one cheap XLA transpose else).
    out = out[:, :, :nq, :]
    if H == 1:
        return out.reshape(B, nq, dv)
    return out.transpose(0, 2, 1, 3).reshape(B, nq, dv)


# ---------------- pure-JAX reference (mirrors the torch code) ----------------

def attention_ref(q, k, v, params, n_head, mask):
    wq, bq, wk, bk, wv, bv = params
    hp = jax.lax.Precision.HIGHEST
    if wq is not None:
        q = jnp.dot(q, wq, precision=hp) + bq
    if wk is not None:
        k = jnp.dot(k, wk, precision=hp) + bk
    if wv is not None:
        v = jnp.dot(v, wv, precision=hp) + bv
    dk = k.shape[-1]
    dv = v.shape[-1]
    m = mask
    if n_head is not None:
        q = q.reshape(*q.shape[:-1], n_head, dk // n_head).swapaxes(-2, -3)
        k = k.reshape(*k.shape[:-1], n_head, dk // n_head).swapaxes(-2, -3)
        v = v.reshape(*v.shape[:-1], n_head, dv // n_head).swapaxes(-2, -3)
        if m is not None:
            m = m[..., None, :, :]
    a = jnp.einsum('...qd,...kd->...qk', q, k, precision=hp) / np.sqrt(dk)
    if m is not None:
        a = jnp.where(m, a, -jnp.inf)
    b = jnp.max(a, axis=-1, keepdims=True)
    b = jnp.where(jnp.isinf(b), 0.0, b)
    a = jnp.exp(a - b)
    a = a / (jnp.sum(a, axis=-1, keepdims=True) + 1e-6)
    x = jnp.einsum('...qk,...kd->...qd', a, v, precision=hp)
    if n_head is not None:
        x = jnp.swapaxes(x, -2, -3)
        x = x.reshape(*x.shape[:-2], dv)
    return x


def _init_linear(key, d_in, d_out, dtype=jnp.float32):
    """nn.Linear init: U(-1/sqrt(d_in), 1/sqrt(d_in)); returns (W^T, b[1, d_out])."""
    kw, kb = jax.random.split(key)
    bound = 1.0 / np.sqrt(d_in)
    w = jax.random.uniform(kw, (d_out, d_in), dtype, -bound, bound)
    b = jax.random.uniform(kb, (1, d_out), dtype, -bound, bound)
    return w.T, b


if __name__ == "__main__":
    def run_case(key, B, nq, nk, d_in, d_model, n_head, mask_kind,
                 block_q=512, block_k=512):
        kq, kk, kv, km, k1, k2, k3 = jax.random.split(key, 7)
        q = jax.random.normal(kq, (B, nq, d_in), jnp.float32)
        k = jax.random.normal(kk, (B, nk, d_in), jnp.float32)
        v = jax.random.normal(kv, (B, nk, d_in), jnp.float32)
        mask = None
        if mask_kind == "batched":
            mask = jax.random.uniform(km, (B, nq, nk)) > 0.3
            mask = mask.at[0, 0, :].set(False)   # fully-masked row -> zero output
        elif mask_kind == "shared":
            mask = jax.random.uniform(km, (nq, nk)) > 0.3   # batch-deduplicated mask
        wq, bq = _init_linear(k1, d_in, d_model)
        wk, bk = _init_linear(k2, d_in, d_model)
        wv, bv = _init_linear(k3, d_in, d_model)
        params = (wq, bq, wk, bk, wv, bv)
        out = attention_pallas(q, k, v, params, n_head=n_head, mask=mask,
                               block_q=block_q, block_k=block_k)
        out = jax.block_until_ready(out)
        ref = attention_ref(q, k, v, params, n_head, mask)
        np.testing.assert_allclose(np.asarray(out), np.asarray(ref),
                                   rtol=2e-3, atol=2e-3)

    key = jax.random.PRNGKey(0)
    k1, k2, k3, k4 = jax.random.split(key, 4)
    # module-scale small shapes, multi-head, per-batch mask (incl. fully-masked row)
    run_case(k1, B=2, nq=8, nk=8, d_in=32, d_model=32, n_head=4, mask_kind="batched")
    # no mask / no head split path
    run_case(k2, B=2, nq=8, nk=8, d_in=32, d_model=32, n_head=None, mask_kind="none")
    # q+k tiling, multi-step online softmax, batch-deduplicated (nq, nk) mask
    run_case(k3, B=2, nq=64, nk=384, d_in=32, d_model=64, n_head=2,
             mask_kind="shared", block_q=32, block_k=128)
    # unaligned nq/nk -> padding path (in-kernel validity mask for padded keys)
    run_case(k4, B=1, nq=40, nk=200, d_in=32, d_model=64, n_head=2,
             mask_kind="none", block_q=32, block_k=128)

    print("KERNEL_OK")
</pallas_src>

<mosaic_0001>
module attributes {stable_mosaic.version = 11 : i64} {
  func.func @_linear_kernel(%arg0: i32, %arg1: i32, %arg2: i32, %arg3: memref<16x32xf32, #tpu.memory_space<vmem>>, %arg4: memref<32x32xf32, #tpu.memory_space<vmem>>, %arg5: memref<1x32xf32, #tpu.memory_space<vmem>>, %arg6: memref<16x32xf32, #tpu.memory_space<vmem>>, %arg7: memref<16x32xf32, #tpu.memory_space<vmem>>) attributes {dimension_semantics = [#tpu.dimension_semantics<parallel>, #tpu.dimension_semantics<parallel>, #tpu.dimension_semantics<arbitrary>], iteration_bounds = array<i64: 1, 1, 1>, scalar_prefetch = 0 : i64, scratch_operands = 1 : i64, tpu.core_type = #tpu.core_type<tc>, window_params = [{transform_indices = @transform_0, window_bounds = array<i64: 16, 32>}, {transform_indices = @transform_1, window_bounds = array<i64: 32, 32>}, {transform_indices = @transform_2, window_bounds = array<i64: 1, 32>}, {transform_indices = @transform_3, window_bounds = array<i64: 16, 32>}]} {
    %c0_i32 = arith.constant 0 : i32
    %0 = arith.cmpi eq, %arg2, %c0_i32 : i32
    %1 = arith.extui %0 : i1 to i32
    %c0_i32_0 = arith.constant 0 : i32
    %2 = arith.cmpi ne, %1, %c0_i32_0 : i32
    scf.if %2 {
      %cst_10 = arith.constant 0.000000e+00 : f32
      %12 = vector.broadcast %cst_10 : f32 to vector<16x32xf32>
      %c0_11 = arith.constant 0 : index
      %c0_12 = arith.constant 0 : index
      %13 = vector.load %arg7[%c0_11, %c0_12] : memref<16x32xf32, #tpu.memory_space<vmem>>, vector<16x32xf32>
      tpu.vector_store %arg7[%c0_11, %c0_12], %12 {strides = array<i32>} : memref<16x32xf32, #tpu.memory_space<vmem>>, vector<16x32xf32>,
    } else {
    }
    %c0 = arith.constant 0 : index
    %c0_1 = arith.constant 0 : index
    %3 = vector.load %arg7[%c0, %c0_1] : memref<16x32xf32, #tpu.memory_space<vmem>>, vector<16x32xf32>
    %c0_2 = arith.constant 0 : index
    %c0_3 = arith.constant 0 : index
    %4 = vector.load %arg3[%c0_2, %c0_3] : memref<16x32xf32, #tpu.memory_space<vmem>>, vector<16x32xf32>
    %c0_4 = arith.constant 0 : index
    %c0_5 = arith.constant 0 : index
    %5 = vector.load %arg4[%c0_4, %c0_5] : memref<32x32xf32, #tpu.memory_space<vmem>>, vector<32x32xf32>
    %cst = arith.constant dense<0.000000e+00> : vector<16x32xf32>
    %6 = tpu.matmul %4, %5, %cst {dimension_numbers = #tpu.dot_dimension_numbers<[1], [0], [0], [1], [0, 0, 1, 1], [], []>} : vector<16x32xf32>, vector<32x32xf32>, vector<16x32xf32> -> vector<16x32xf32>
    %7 = arith.addf %3, %6 : vector<16x32xf32>
    %c0_6 = arith.constant 0 : index
    %c0_7 = arith.constant 0 : index
    %8 = vector.load %arg7[%c0_6, %c0_7] : memref<16x32xf32, #tpu.memory_space<vmem>>, vector<16x32xf32>
    tpu.vector_store %arg7[%c0_6, %c0_7], %7 {strides = array<i32>} : memref<16x32xf32, #tpu.memory_space<vmem>>, vector<16x32xf32>,
    %c0_i32_8 = arith.constant 0 : i32
    %9 = arith.cmpi eq, %arg2, %c0_i32_8 : i32
    %10 = arith.extui %9 : i1 to i32
    %c0_i32_9 = arith.constant 0 : i32
    %11 = arith.cmpi ne, %10, %c0_i32_9 : i32
    scf.if %11 {
      %c0_10 = arith.constant 0 : index
      %c0_11 = arith.constant 0 : index
      %12 = vector.load %arg7[%c0_10, %c0_11] : memref<16x32xf32, #tpu.memory_space<vmem>>, vector<16x32xf32>
      %c0_12 = arith.constant 0 : index
      %c0_13 = arith.constant 0 : index
      %13 = vector.load %arg5[%c0_12, %c0_13] : memref<1x32xf32, #tpu.memory_space<vmem>>, vector<1x32xf32>
      %14 = vector.broadcast %13 : vector<1x32xf32> to vector<16x32xf32>
      %15 = arith.addf %12, %14 : vector<16x32xf32>
      %c0_14 = arith.constant 0 : index
      %c0_15 = arith.constant 0 : index
      %16 = vector.load %arg6[%c0_14, %c0_15] : memref<16x32xf32, #tpu.memory_space<vmem>>, vector<16x32xf32>
      tpu.vector_store %arg6[%c0_14, %c0_15], %15 {strides = array<i32>} : memref<16x32xf32, #tpu.memory_space<vmem>>, vector<16x32xf32>,
    } else {
    }
    return
  }
  func.func @transform_0(%arg0: i32, %arg1: i32, %arg2: i32) -> (i32, i32) {
    %c0_i32 = arith.constant 0 : i32
    return %arg0, %arg2 : i32, i32
  }
  func.func @transform_1(%arg0: i32, %arg1: i32, %arg2: i32) -> (i32, i32) {
    %c0_i32 = arith.constant 0 : i32
    return %arg2, %arg1 : i32, i32
  }
  func.func @transform_2(%arg0: i32, %arg1: i32, %arg2: i32) -> (i32, i32) {
    %c0_i32 = arith.constant 0 : i32
    %c0_i32_0 = arith.constant 0 : i32
    return %c0_i32, %arg1 : i32, i32
  }
  func.func @transform_3(%arg0: i32, %arg1: i32, %arg2: i32) -> (i32, i32) {
    %c0_i32 = arith.constant 0 : i32
    return %arg0, %arg1 : i32, i32
  }
}

</mosaic_0001>

<bundles_post_ra>
// kernel: tpu_custom_call.1
= control target key start
LH: loop header
LB: loop body
LE: loop exit
PB: predicated region body
PF: predicated region fallthrough
CT: control target
= control target key end

     0   :  { %8 = vsyncpa [#allocation4], 0  ;;  %s325_s0 = inlined_call_operand.hbm [shape: f32[16,32], index: 0, kind: input, shape index: {}]   ;;  %s326_s1 = inlined_call_operand.hbm [shape: f32[32,32], index: 1, kind: input, shape index: {}]   ;;  %s327_s2 = inlined_call_operand.vmem [shape: f32[1,32], index: 2, kind: input, shape index: {}]   ;;  %s328_s3 = inlined_call_operand.hbm [shape: f32[16,32], index: 3, kind: output, shape index: {}]  }
   0x1   :  { %9 = vsyncpa [#allocation7], 0 }
   0x2   :  { %10 = vsyncpa [#allocation5], 0  ;;  %s270_s12 = smov [#allocation3]  }
   0x3   :  { %s16_s13 = sshll.u32 %s270_s12, 4  ;;  %s17_s13 = int_to_ptr.vmem [resolvable:$true] %s16_s13 }
   0x4   :  { %s212_s14 = scalar_lea.vmem %s17_s13, 256  ;;  %p217_p1 = scmp.lt.s32.totalorder %s17_s13, %s17_s13 }
   0x5   :  { %p213_p0 = scmp.ne.s32.totalorder %s17_s13, %s212_s14  ;;  %p218_p2 = scmp.lt.s32.totalorder %s212_s14, %s212_s14 }
   0x7   :  { %p219_p3 = por %p218_p2, %p217_p1 }
   0x9   :  { %p220_p4 = pnand %p219_p3, %p213_p0 }
   0xb   :  { %223 = shalt.err (!%p220_p4)
}
   0xc   :  { %s271_s15 = smov 128   ;;  %s272_s16 = smov 8  }
   0xd   :  { %22 = dma.hbm_to_vmem [thread:$0]  %s325_s0, 256, %s17_s13, [#allocation4], %s271_s15, %s271_s15, %s272_s16  }
   0xe   :  { %s273_s19 = smov [#allocation6]  }
   0xf   :  { %s28_s20 = sshll.u32 %s273_s19, 4  ;;  %s29_s20 = int_to_ptr.vmem [resolvable:$true] %s28_s20 }
  0x10   :  { %s232_s21 = scalar_lea.vmem %s29_s20, 512  ;;  %p237_p6 = scmp.lt.s32.totalorder %s29_s20, %s29_s20 }
  0x11   :  { %p233_p5 = scmp.ne.s32.totalorder %s29_s20, %s232_s21  ;;  %p238_p7 = scmp.lt.s32.totalorder %s232_s21, %s232_s21 }
  0x13   :  { %p239_p8 = por %p238_p7, %p237_p6 }
  0x15   :  { %p240_p9 = pnand %p239_p8, %p233_p5 }
  0x17   :  { %243 = shalt.err (!%p240_p9)
}
  0x18   :  { %34 = dma.hbm_to_vmem [thread:$0]  %s326_s1, 512, %s29_s20, [#allocation7], %s271_s15, %s271_s15, %s272_s16  }
  0x19   :  { %264 = dma.done.wait [#allocation4], 256  }
  0x1a   :  { %265 = vsyncadd [#allocation4], 4294967040 }
  0x1b   :  { %266 = dma.done.wait [#allocation7], 512  }
  0x1c   :  { %267 = vsyncadd [#allocation7], 4294966784  ;;  %vm47_vm0 = vcmask 261120   ;;  %v274_v0 = vmov 0.0   ;;  %v57_v1 = vld [vmem:[#allocation6 + $0x18] sm:$0xff]  ;;  %v56_v2 = vld [vmem:[#allocation6 + $0x10] sm:$0xff] }
  0x1d   :  { %49 = vst.msk [vmem:[#allocation2 + $0x8] sm:$0xff] %vm47_vm0, %v274_v0  ;;  %48 = vst.msk [vmem:[#allocation2] sm:$0xff] %vm47_vm0, %v274_v0  ;;  %187 = vmatprep.subr.mxu0 %v57_v1  ;;  %v52_v3 = vld [vmem:[#allocation3] sm:$0xff]  ;;  %v55_v4 = vld [vmem:[#allocation6 + $0x8] sm:$0xff]  ;;  %s275_s24 = smov [#allocation8]  }
  0x1e   :  { %188 = vmatpush3.msra.mxu0 %v57_v1  ;;  %195 = vmatprep.mubr.msk.f32.mxu0 %vm47_vm0, %v52_v3  ;;  %v54_v5 = vld [vmem:[#allocation6] sm:$0xff]  ;;  %v53_v6 = vld [vmem:[#allocation3 + $0x8] sm:$0xff]  ;;  %s165_s25 = sshll.u32 %s275_s24, 4  ;;  %s166_s25 = int_to_ptr.vmem [resolvable:$true] %s165_s25 }
  0x1f   :  { %189 = vmatprep.subr.mxu0 %v56_v2  ;;  %v180_v13 = vld [vmem:[%s327_s2] ss:$0 sm:$0xff]  ;;  %s244_s26 = scalar_lea.vmem %s166_s25, 256  ;;  %p249_p11 = scmp.lt.s32.totalorder %s166_s25, %s166_s25 }
  0x20   :  { %190 = vmatpush3.msra.mxu0 %v56_v2  ;;  %p245_p10 = scmp.ne.s32.totalorder %s166_s25, %s244_s26  ;;  %p250_p12 = scmp.lt.s32.totalorder %s244_s26, %s244_s26 }
  0x21   :  { %191 = vmatprep.subr.mxu0 %v55_v4 }
  0x22   :  { %192 = vmatpush3.msra.mxu0 %v55_v4  ;;  %p251_p13 = por %p250_p12, %p249_p11 }
  0x23   :  { %193 = vmatprep.subr.mxu0 %v54_v5 }
  0x24   :  { %194 = vmatpush3.msra.mxu0 %v54_v5  ;;  %v51_v7 = vld [vmem:[#allocation2 + $0x8] sm:$0xff]  ;;  %v50_v9 = vld [vmem:[#allocation2] sm:$0xff]  ;;  %p252_p0 = pnand %p251_p13, %p245_p10 }
  0x25   :  { %196 = vmatmul.mubr.msk.f32.vlgmr.msra.gmra.mxu0 %vm47_vm0, %v53_v6 }
  0xe5   :  { %v197_v8 = vpop.f32.mrf.mxu0 }
  0xe6   :  { %v141_v10 = vadd.f32 %v197_v8, %v51_v7 }
  0xe7   :  { %v131_v11 = vpop.f32.mrf.mxu0 }
  0xe8   :  { %143 = vst.msk [vmem:[#allocation2 + $0x8] sm:$0xff] %vm47_vm0, %v141_v10  ;;  %v140_v12 = vadd.f32 %v131_v11, %v50_v9 }
  0xea   :  { %142 = vst.msk [vmem:[#allocation2] sm:$0xff] %vm47_vm0, %v140_v12 }
  0xef   :  { %v148_v14 = vld [vmem:[#allocation2 + $0x8] sm:$0xff] }
  0xf0   :  { %v157_v15 = vadd.f32 %v180_v13, %v148_v14 }
  0xf1   :  { %v147_v16 = vld [vmem:[#allocation2] sm:$0xff] }
  0xf2   :  { %v156_v17 = vadd.f32 %v180_v13, %v147_v16  ;;  %159 = vst.msk [vmem:[#allocation8 + $0x8] sm:$0xff] %vm47_vm0, %v157_v15 }
  0xf4   :  { %158 = vst.msk [vmem:[#allocation8] sm:$0xff] %vm47_vm0, %v156_v17 }
  0xf5   :  { %255 = shalt.err (!%p252_p0)
}
  0xf6   :  { %171 = dma.vmem_to_hbm [thread:$0]  %s166_s25, 256, %s328_s3, [#allocation5], %s271_s15, %s271_s15, %s272_s16  }
  0xf7   :  { %268 = dma.done.wait [#allocation5], 256  }
  0xf8   :  { %269 = vsyncadd [#allocation5], 4294967040 }
  0xf9   :  { %175 = vsyncpa [#allocation4], 1 }
  0xfa   :  { %176 = vsyncpa [#allocation7], 1 }
  0xfb   :  { %177 = vsyncpa [#allocation5], 1 }

</bundles_post_ra>
